<compile_context>
chip_gen: v7x
topology: tpu7x:2x2x1
jax: 0.10.0
libtpu: 0.0.40
codegen_flags: <defaults>
</compile_context>

<pallas_src>
import jax
import jax.numpy as jnp
from jax.experimental import pallas as pl
from jax.experimental.pallas import tpu as pltpu

REL_L1_THRESH = 0.6
TM_TARGET = 512                 # matmul row-tile target (weight-BW bound below this)
ELEMWISE_BYTES_TARGET = 2 << 20 # ~2 MiB per input block for mem-bound elementwise ops


# ----------------------------- sizing helpers -------------------------------- #

def _round_up(x, m):
    return ((x + m - 1) // m) * m


def _chip_vmem_bytes():
    """Physical VMEM of the local chip; conservative 64 MiB (v7x) fallback."""
    try:
        info = pltpu.get_tpu_info()
        v = getattr(info, "vmem_capacity_bytes", None)
        if v:
            return int(v)
    except Exception:
        pass
    return 64 * 1024 * 1024


def _pick_h_tile(H, target):
    """Largest 128-aligned divisor of H that is <= target, else the full extent."""
    if H <= target or H % 128 != 0:
        return H
    t = target - target % 128
    while t >= 128:
        if H % t == 0:
            return t
        t -= 128
    return H   # TODO(synk): pad H (zero weight columns) for pathological hidden sizes


def _mlp_vmem_bytes(tm, D, th, act_bytes, n_row_slabs):
    """Rough double-buffered working set of one MLP pallas_call."""
    weights = 2 * (D * th + th * D) * 2            # w1 + w2, bf16, 2x buffered
    biases = 2 * (th + D) * 4                      # f32 biases (sublane-padded, small)
    rows = 2 * n_row_slabs * tm * D * act_bytes    # (tm, D) operands, 2x buffered
    acc = tm * D * 4                               # resident f32 accumulator scratch
    return weights + biases + rows + acc


def _pick_mlp_tiles(M, D, H, act_bytes, n_row_slabs):
    """Choose (tm, th, padded M, vmem_limit) for an MLP kernel, per-generation VMEM aware."""
    chip_vmem = _chip_vmem_bytes()
    budget = int(chip_vmem * 0.6)                  # leave headroom for compiler scratch
    h_target0 = 1024 if chip_vmem >= (100 << 20) else 512
    tm, th = 128, _pick_h_tile(H, 128)
    for h_target in (h_target0, 512, 256, 128):
        th_c = _pick_h_tile(H, h_target)
        tm_c = TM_TARGET
        while tm_c > 128 and _mlp_vmem_bytes(tm_c, D, th_c, act_bytes, n_row_slabs) > budget:
            tm_c //= 2
        if _mlp_vmem_bytes(tm_c, D, th_c, act_bytes, n_row_slabs) <= budget:
            tm, th = tm_c, th_c
            break
    # Avoid gross row-padding waste (padded rows cost real MXU flops + HBM bytes).
    while tm > 128 and M > 0 and (_round_up(M, tm) - M) * 4 > M:
        tm //= 2
    if M <= tm:
        tm = max(8, _round_up(M, 8))
    Mp = _round_up(M, tm)
    need = _mlp_vmem_bytes(tm, D, th, act_bytes, n_row_slabs)
    vmem_limit = int(min(chip_vmem - (4 << 20), max(need + (16 << 20), 32 << 20)))
    return tm, th, Mp, vmem_limit


def _pick_ew_tile(M, D, itemsize):
    """Byte-sized row tile (~2 MiB/input) for mem-bound elementwise kernels."""
    target_rows = max(8, (ELEMWISE_BYTES_TARGET // max(D * itemsize, 1)) // 8 * 8)
    tm = min(target_rows, _round_up(M, 8))
    while tm > 64 and (_round_up(M, tm) - M) * 8 > M:
        tm = max(8, (tm // 2) // 8 * 8)
    Mp = _round_up(M, tm)
    return tm, Mp


def _pad_rows(x2d, Mp):
    M = x2d.shape[0]
    if Mp == M:
        return x2d
    return jnp.pad(x2d, ((0, Mp - M), (0, 0)))


# ----------------------------- Pallas kernels -------------------------------- #

def _mlp_block_kernel(x_ref, w1_ref, b1_ref, w2_ref, b2_ref, o_ref, acc_ref):
    """Synthetic residual transformer block: x + W2 @ gelu(W1 @ x), H-tiled reduction."""
    k = pl.program_id(1)

    @pl.when(k == 0)
    def _():
        acc_ref[...] = jnp.zeros_like(acc_ref)

    x = x_ref[...]                                                    # bf16 (tm, D)
    h = jnp.dot(x, w1_ref[...], preferred_element_type=jnp.float32)   # (tm, th) f32
    h = jax.nn.gelu(h + b1_ref[...], approximate=True)
    acc_ref[...] += jnp.dot(h.astype(w2_ref.dtype), w2_ref[...],
                            preferred_element_type=jnp.float32)

    @pl.when(k == pl.num_programs(1) - 1)
    def _():
        y = acc_ref[...] + b2_ref[...] + x.astype(jnp.float32)
        o_ref[...] = y.astype(o_ref.dtype)


def _mlp_block_res_kernel(x_ref, orig_ref, w1_ref, b1_ref, w2_ref, b2_ref,
                          o_ref, res_ref, acc_ref):
    """Same block, but also emits (out - orig) so the residual-cache subtraction is fused."""
    k = pl.program_id(1)

    @pl.when(k == 0)
    def _():
        acc_ref[...] = jnp.zeros_like(acc_ref)

    x = x_ref[...]
    h = jnp.dot(x, w1_ref[...], preferred_element_type=jnp.float32)
    h = jax.nn.gelu(h + b1_ref[...], approximate=True)
    acc_ref[...] += jnp.dot(h.astype(w2_ref.dtype), w2_ref[...],
                            preferred_element_type=jnp.float32)

    @pl.when(k == pl.num_programs(1) - 1)
    def _():
        y = acc_ref[...] + b2_ref[...] + x.astype(jnp.float32)
        o_ref[...] = y.astype(o_ref.dtype)
        res_ref[...] = (y - orig_ref[...].astype(jnp.float32)).astype(res_ref.dtype)


def _make_mlp_l1_kernel(tm, m_valid, has_pad):
    """Block-0 hidden-stream kernel with fused rel-L1 stats vs the cached modulated inputs."""
    def kernel(x_ref, prev_ref, w1_ref, b1_ref, w2_ref, b2_ref,
               o_ref, diff_ref, norm_ref, acc_ref):
        i = pl.program_id(0)
        k = pl.program_id(1)

        @pl.when(jnp.logical_and(i == 0, k == 0))
        def _():
            diff_ref[...] = jnp.zeros_like(diff_ref)
            norm_ref[...] = jnp.zeros_like(norm_ref)

        @pl.when(k == 0)
        def _():
            acc_ref[...] = jnp.zeros_like(acc_ref)

        x = x_ref[...]
        h = jnp.dot(x, w1_ref[...], preferred_element_type=jnp.float32)
        h = jax.nn.gelu(h + b1_ref[...], approximate=True)
        acc_ref[...] += jnp.dot(h.astype(w2_ref.dtype), w2_ref[...],
                                preferred_element_type=jnp.float32)

        @pl.when(k == pl.num_programs(1) - 1)
        def _():
            y = acc_ref[...] + b2_ref[...] + x.astype(jnp.float32)
            y_out = y.astype(o_ref.dtype)
            o_ref[...] = y_out
            # Fused L1 stats: one scalar reduce per row tile, hidden under the MXU work;
            # saves the separate 2*M*D-byte reduction pass every diffusion step.
            prev = prev_ref[...].astype(jnp.float32)
            cur = y_out.astype(jnp.float32)
            d = jnp.abs(prev - cur)
            n = jnp.abs(prev)
            if has_pad:
                row = i * tm + jax.lax.broadcasted_iota(jnp.int32, d.shape, 0)
                valid = row < m_valid
                d = jnp.where(valid, d, 0.0)
                n = jnp.where(valid, n, 0.0)
            diff_ref[...] += jnp.sum(d).reshape(1, 1)
            norm_ref[...] += jnp.sum(n).reshape(1, 1)

    return kernel


def _add_kernel(a_ref, b_ref, o_ref):
    o_ref[...] = a_ref[...] + b_ref[...]


def _sub_kernel(a_ref, b_ref, o_ref):
    o_ref[...] = a_ref[...] - b_ref[...]


# ----------------------------- Pallas wrappers ------------------------------- #

def mlp_block(x, p):
    """Apply one synthetic block to a (B, S, D) tensor via a tiled Pallas matmul."""
    B, S, D = x.shape
    M = B * S
    H = p["w1"].shape[1]
    act_bytes = jnp.dtype(x.dtype).itemsize
    tm, th, Mp, vmem_limit = _pick_mlp_tiles(M, D, H, act_bytes, n_row_slabs=2)  # x, out
    x2 = _pad_rows(x.reshape(M, D), Mp)
    out = pl.pallas_call(
        _mlp_block_kernel,
        out_shape=jax.ShapeDtypeStruct((Mp, D), x.dtype),
        grid=(Mp // tm, H // th),
        in_specs=[
            pl.BlockSpec((tm, D), lambda i, k: (i, 0)),   # x
            pl.BlockSpec((D, th), lambda i, k: (0, k)),   # w1
            pl.BlockSpec((1, th), lambda i, k: (0, k)),   # b1
            pl.BlockSpec((th, D), lambda i, k: (k, 0)),   # w2
            pl.BlockSpec((1, D), lambda i, k: (0, 0)),    # b2
        ],
        out_specs=pl.BlockSpec((tm, D), lambda i, k: (i, 0)),
        scratch_shapes=[pltpu.VMEM((tm, D), jnp.float32)],
        compiler_params=pltpu.CompilerParams(
            dimension_semantics=("parallel", "arbitrary"),
            vmem_limit_bytes=vmem_limit),
    )(x2, p["w1"], p["b1"], p["w2"], p["b2"])
    return out[:M].reshape(B, S, D)


def mlp_block_with_residual(x, orig, p):
    """Last block of the compute path: returns (out, out - orig) from one pallas_call."""
    B, S, D = x.shape
    M = B * S
    H = p["w1"].shape[1]
    act_bytes = jnp.dtype(x.dtype).itemsize
    tm, th, Mp, vmem_limit = _pick_mlp_tiles(M, D, H, act_bytes, n_row_slabs=4)  # x, orig, out, res
    x2 = _pad_rows(x.reshape(M, D), Mp)
    o2 = _pad_rows(orig.reshape(M, D), Mp)
    out, res = pl.pallas_call(
        _mlp_block_res_kernel,
        out_shape=(jax.ShapeDtypeStruct((Mp, D), x.dtype),
                   jax.ShapeDtypeStruct((Mp, D), x.dtype)),
        grid=(Mp // tm, H // th),
        in_specs=[
            pl.BlockSpec((tm, D), lambda i, k: (i, 0)),   # x
            pl.BlockSpec((tm, D), lambda i, k: (i, 0)),   # orig
            pl.BlockSpec((D, th), lambda i, k: (0, k)),   # w1
            pl.BlockSpec((1, th), lambda i, k: (0, k)),   # b1
            pl.BlockSpec((th, D), lambda i, k: (k, 0)),   # w2
            pl.BlockSpec((1, D), lambda i, k: (0, 0)),    # b2
        ],
        out_specs=(pl.BlockSpec((tm, D), lambda i, k: (i, 0)),
                   pl.BlockSpec((tm, D), lambda i, k: (i, 0))),
        scratch_shapes=[pltpu.VMEM((tm, D), jnp.float32)],
        compiler_params=pltpu.CompilerParams(
            dimension_semantics=("parallel", "arbitrary"),
            vmem_limit_bytes=vmem_limit),
    )(x2, o2, p["w1"], p["b1"], p["w2"], p["b2"])
    return out[:M].reshape(B, S, D), res[:M].reshape(B, S, D)


def mlp_block_with_l1(x, prev_modulated, p):
    """Block 0 (hidden stream): block output + fused L1 stats vs prev_modulated.

    Returns (out, sum|prev - out|, sum|prev|).  Row axis is 'arbitrary' because the
    scalar stats outputs are resident across it (acceptable: block 0 only).
    """
    B, S, D = x.shape
    M = B * S
    H = p["w1"].shape[1]
    act_bytes = jnp.dtype(x.dtype).itemsize
    tm, th, Mp, vmem_limit = _pick_mlp_tiles(M, D, H, act_bytes, n_row_slabs=3)  # x, prev, out
    x2 = _pad_rows(x.reshape(M, D), Mp)
    p2 = _pad_rows(prev_modulated.reshape(M, D), Mp)
    kernel = _make_mlp_l1_kernel(tm, M, has_pad=(Mp != M))
    out, diff, norm = pl.pallas_call(
        kernel,
        out_shape=(jax.ShapeDtypeStruct((Mp, D), x.dtype),
                   jax.ShapeDtypeStruct((1, 1), jnp.float32),
                   jax.ShapeDtypeStruct((1, 1), jnp.float32)),
        grid=(Mp // tm, H // th),
        in_specs=[
            pl.BlockSpec((tm, D), lambda i, k: (i, 0)),   # x
            pl.BlockSpec((tm, D), lambda i, k: (i, 0)),   # prev_modulated
            pl.BlockSpec((D, th), lambda i, k: (0, k)),   # w1
            pl.BlockSpec((1, th), lambda i, k: (0, k)),   # b1
            pl.BlockSpec((th, D), lambda i, k: (k, 0)),   # w2
            pl.BlockSpec((1, D), lambda i, k: (0, 0)),    # b2
        ],
        out_specs=(pl.BlockSpec((tm, D), lambda i, k: (i, 0)),
                   pl.BlockSpec((1, 1), lambda i, k: (0, 0)),
                   pl.BlockSpec((1, 1), lambda i, k: (0, 0))),
        scratch_shapes=[pltpu.VMEM((tm, D), jnp.float32)],
        compiler_params=pltpu.CompilerParams(
            dimension_semantics=("arbitrary", "arbitrary"),
            vmem_limit_bytes=vmem_limit),
    )(x2, p2, p["w1"], p["b1"], p["w2"], p["b2"])
    return out[:M].reshape(B, S, D), diff[0, 0], norm[0, 0]


def dual_block(hidden, encoder, p):
    """Dual-stream transformer block: independent residual MLPs per stream."""
    return mlp_block(hidden, p["h"]), mlp_block(encoder, p["e"])


def _elementwise(kernel, a, b, alias=False):
    B, S, D = a.shape
    M = B * S
    itemsize = jnp.dtype(a.dtype).itemsize
    tm, Mp = _pick_ew_tile(M, D, itemsize)
    a2 = _pad_rows(a.reshape(M, D), Mp)
    b2 = _pad_rows(b.reshape(M, D), Mp)
    kwargs = dict(input_output_aliases={0: 0}) if alias else {}
    out = pl.pallas_call(
        kernel,
        out_shape=jax.ShapeDtypeStruct((Mp, D), a.dtype),
        grid=(Mp // tm,),
        in_specs=[pl.BlockSpec((tm, D), lambda i: (i, 0)),
                  pl.BlockSpec((tm, D), lambda i: (i, 0))],
        out_specs=pl.BlockSpec((tm, D), lambda i: (i, 0)),
        compiler_params=pltpu.CompilerParams(dimension_semantics=("parallel",)),
        **kwargs,
    )(a2, b2)
    return out[:M].reshape(B, S, D)


def pallas_add(a, b, alias=False):
    return _elementwise(_add_kernel, a, b, alias=alias)


def pallas_sub(a, b):
    return _elementwise(_sub_kernel, a, b)


# ----------------------------- forward (semantics) --------------------------- #

def forward(params, state, hidden_states, encoder_hidden_states):
    # get_modulated_inputs: run first transformer block.  L1 stats against the cached
    # modulated inputs are fused into the hidden-stream kernel epilogue.
    first_hidden, l1_diff, l1_norm = mlp_block_with_l1(
        hidden_states, state["modulated_inputs"], params["blocks"][0]["h"])
    first_encoder = mlp_block(encoder_hidden_states, params["blocks"][0]["e"])
    modulated = first_hidden
    orig_hidden, orig_encoder = first_hidden, first_encoder

    # are_two_tensor_similar: rel L1 distance below threshold (only if a prev exists).
    # Mean denominators cancel, so the ratio of sums equals the torch expression.
    # Guard against the all-zero first-step cache (result masked by `valid` anyway).
    dist = l1_diff / jnp.maximum(l1_norm, 1e-6)
    use_cache = jnp.logical_and(state["valid"], dist < REL_L1_THRESH)

    def cached_branch(_):
        h = pallas_add(hidden_states, state["hidden_states_residual"], alias=True)
        e = pallas_add(encoder_hidden_states, state["encoder_hidden_states_residual"], alias=True)
        return h, e, state["hidden_states_residual"], state["encoder_hidden_states_residual"]

    def compute_branch(_):
        # process_blocks(start_idx=1, orig_hidden, orig_encoder); return_hidden_states_first=True
        h, e = orig_hidden, orig_encoder
        for blk in params["blocks"][1:]:
            h, e = dual_block(h, e, blk)
        single = params["single_blocks"]
        if single:
            # torch.cat([encoder, hidden], dim=1): single blocks run on one combined row
            # slab (bigger row extents -> better v7x megacore use, fewer launches), then
            # the residual subtraction is fused into the last block and split back out.
            S_e = e.shape[1]
            cat = jnp.concatenate([e, h], axis=1)
            cat_orig = jnp.concatenate([orig_encoder, orig_hidden], axis=1)
            for sblk in single[:-1]:
                cat = mlp_block(cat, sblk)
            cat, cat_res = mlp_block_with_residual(cat, cat_orig, single[-1])
            e2, h2 = cat[:, :S_e], cat[:, S_e:]
            e_res, h_res = cat_res[:, :S_e], cat_res[:, S_e:]
        else:
            h2, e2 = h, e
            h_res = pallas_sub(h2, orig_hidden)
            e_res = pallas_sub(e2, orig_encoder)
        return h2, e2, h_res, e_res

    h_out, e_out, h_res, e_res = jax.lax.cond(use_cache, cached_branch, compute_branch, None)

    new_state = dict(
        modulated_inputs=modulated,
        valid=jnp.array(True),
        hidden_states_residual=h_res,
        encoder_hidden_states_residual=e_res,
        use_cache=use_cache,
        cnt=state["cnt"] + 1,
    )
    # return_hidden_states_first=True
    return (h_out, e_out), new_state


# ----------------------------- parameter / state init ------------------------ #

def _init_mlp(key, D, H, scale=0.05):
    k1, k2 = jax.random.split(key)
    return dict(
        # bf16 weights (native MXU fast path); f32 biases folded into the f32 accumulator.
        w1=(scale * jax.random.normal(k1, (D, H), jnp.float32)).astype(jnp.bfloat16),
        b1=jnp.zeros((1, H), jnp.float32),
        w2=(scale * jax.random.normal(k2, (H, D), jnp.float32)).astype(jnp.bfloat16),
        b2=jnp.zeros((1, D), jnp.float32),
    )


def init_params(key, D, H, num_blocks, num_single_blocks):
    keys = jax.random.split(key, 2 * num_blocks + max(num_single_blocks, 1))
    blocks = [
        dict(h=_init_mlp(keys[2 * i], D, H), e=_init_mlp(keys[2 * i + 1], D, H))
        for i in range(num_blocks)
    ]
    single = [_init_mlp(keys[2 * num_blocks + j], D, H) for j in range(num_single_blocks)]
    return dict(blocks=blocks, single_blocks=single)


def init_state(B, S, S_enc, D, dtype=jnp.bfloat16):
    return dict(
        modulated_inputs=jnp.zeros((B, S, D), dtype),
        valid=jnp.array(False),
        hidden_states_residual=jnp.zeros((B, S, D), dtype),
        encoder_hidden_states_residual=jnp.zeros((B, S_enc, D), dtype),
        use_cache=jnp.array(False),
        cnt=jnp.array(0, jnp.int32),
    )


# ----------------------------------- main ------------------------------------ #

if __name__ == "__main__":
    # Small lane-dense demo shapes (real models would use D, H as multiples of 256 to
    # keep the 256-wide v6e/v7x MXU full; padding/tiling here handles any B, S).
    B, S, S_ENC, D, H = 2, 16, 8, 128, 256
    key = jax.random.PRNGKey(0)
    k_h, k_e, k_p = jax.random.split(key, 3)
    hidden = jax.random.normal(k_h, (B, S, D), jnp.float32).astype(jnp.bfloat16)
    encoder = jax.random.normal(k_e, (B, S_ENC, D), jnp.float32).astype(jnp.bfloat16)

    params = init_params(k_p, D, H, num_blocks=2, num_single_blocks=1)
    state = init_state(B, S, S_ENC, D)

    # step 1: no cached modulated inputs -> full transformer-block path
    (h1, e1), state = forward(params, state, hidden, encoder)
    # step 2: identical inputs -> L1 distance ~0 -> cached residual-add path
    (h2, e2), state = forward(params, state, hidden, encoder)

    jax.block_until_ready((h1, e1, h2, e2, state))
    assert h1.shape == (B, S, D) and e1.shape == (B, S_ENC, D)
    assert h2.shape == (B, S, D) and e2.shape == (B, S_ENC, D)
    assert bool(state["use_cache"])          # second step took the cache branch
    print("KERNEL_OK")
</pallas_src>

<mosaic_0001>
module attributes {stable_mosaic.version = 11 : i64} {
  func.func @kernel(%arg0: i32, %arg1: i32, %arg2: memref<32x128xbf16, #tpu.memory_space<vmem>>, %arg3: memref<32x128xbf16, #tpu.memory_space<vmem>>, %arg4: memref<128x256xbf16, #tpu.memory_space<vmem>>, %arg5: memref<1x256xf32, #tpu.memory_space<vmem>>, %arg6: memref<256x128xbf16, #tpu.memory_space<vmem>>, %arg7: memref<1x128xf32, #tpu.memory_space<vmem>>, %arg8: memref<32x128xbf16, #tpu.memory_space<vmem>>, %arg9: memref<1x1xf32, #tpu.memory_space<vmem>>, %arg10: memref<1x1xf32, #tpu.memory_space<vmem>>, %arg11: memref<32x128xf32, #tpu.memory_space<vmem>>) attributes {dimension_semantics = [#tpu.dimension_semantics<arbitrary>, #tpu.dimension_semantics<arbitrary>], iteration_bounds = array<i64: 1, 1>, scalar_prefetch = 0 : i64, scratch_operands = 1 : i64, tpu.core_type = #tpu.core_type<tc>, window_params = [{transform_indices = @transform_0, window_bounds = array<i64: 32, 128>}, {transform_indices = @transform_1, window_bounds = array<i64: 32, 128>}, {transform_indices = @transform_2, window_bounds = array<i64: 128, 256>}, {transform_indices = @transform_3, window_bounds = array<i64: 1, 256>}, {transform_indices = @transform_4, window_bounds = array<i64: 256, 128>}, {pipeline_mode = #tpu.pipeline_mode<synchronous>, transform_indices = @transform_5, window_bounds = array<i64: 1, 128>}, {transform_indices = @transform_6, window_bounds = array<i64: 32, 128>}, {pipeline_mode = #tpu.pipeline_mode<synchronous>, transform_indices = @transform_7, window_bounds = array<i64: 1, 1>}, {pipeline_mode = #tpu.pipeline_mode<synchronous>, transform_indices = @transform_8, window_bounds = array<i64: 1, 1>}]} {
    %c0_i32 = arith.constant 0 : i32
    %0 = arith.cmpi eq, %arg0, %c0_i32 : i32
    %c0_i32_0 = arith.constant 0 : i32
    %1 = arith.cmpi eq, %arg1, %c0_i32_0 : i32
    %2 = arith.andi %0, %1 : i1
    %3 = arith.extui %2 : i1 to i32
    %c0_i32_1 = arith.constant 0 : i32
    %4 = arith.cmpi ne, %3, %c0_i32_1 : i32
    scf.if %4 {
      %cst_22 = arith.constant 0.000000e+00 : f32
      %36 = vector.broadcast %cst_22 : f32 to vector<1x1xf32>
      %c0_23 = arith.constant 0 : index
      %c0_24 = arith.constant 0 : index
      %37 = vector.load %arg9[%c0_23, %c0_24] : memref<1x1xf32, #tpu.memory_space<vmem>>, vector<1x1xf32>
      tpu.vector_store %arg9[%c0_23, %c0_24], %36 {strides = array<i32>} : memref<1x1xf32, #tpu.memory_space<vmem>>, vector<1x1xf32>,
      %cst_25 = arith.constant 0.000000e+00 : f32
      %38 = vector.broadcast %cst_25 : f32 to vector<1x1xf32>
      %c0_26 = arith.constant 0 : index
      %c0_27 = arith.constant 0 : index
      %39 = vector.load %arg10[%c0_26, %c0_27] : memref<1x1xf32, #tpu.memory_space<vmem>>, vector<1x1xf32>
      tpu.vector_store %arg10[%c0_26, %c0_27], %38 {strides = array<i32>} : memref<1x1xf32, #tpu.memory_space<vmem>>, vector<1x1xf32>,
    } else {
    }
    %c0_i32_2 = arith.constant 0 : i32
    %5 = arith.cmpi eq, %arg1, %c0_i32_2 : i32
    %6 = arith.extui %5 : i1 to i32
    %c0_i32_3 = arith.constant 0 : i32
    %7 = arith.cmpi ne, %6, %c0_i32_3 : i32
    scf.if %7 {
      %cst_22 = arith.constant 0.000000e+00 : f32
      %36 = vector.broadcast %cst_22 : f32 to vector<32x128xf32>
      %c0_23 = arith.constant 0 : index
      %c0_24 = arith.constant 0 : index
      %37 = vector.load %arg11[%c0_23, %c0_24] : memref<32x128xf32, #tpu.memory_space<vmem>>, vector<32x128xf32>
      tpu.vector_store %arg11[%c0_23, %c0_24], %36 {strides = array<i32>} : memref<32x128xf32, #tpu.memory_space<vmem>>, vector<32x128xf32>,
    } else {
    }
    %c0 = arith.constant 0 : index
    %c0_4 = arith.constant 0 : index
    %8 = vector.load %arg2[%c0, %c0_4] : memref<32x128xbf16, #tpu.memory_space<vmem>>, vector<32x128xbf16>
    %c0_5 = arith.constant 0 : index
    %c0_6 = arith.constant 0 : index
    %9 = vector.load %arg4[%c0_5, %c0_6] : memref<128x256xbf16, #tpu.memory_space<vmem>>, vector<128x256xbf16>
    %cst = arith.constant dense<0.000000e+00> : vector<32x256xf32>
    %10 = tpu.matmul %8, %9, %cst {dimension_numbers = #tpu.dot_dimension_numbers<[1], [0], [0], [1], [0, 0, 1, 1], [], []>} : vector<32x128xbf16>, vector<128x256xbf16>, vector<32x256xf32> -> vector<32x256xf32>
    %c0_7 = arith.constant 0 : index
    %c0_8 = arith.constant 0 : index
    %11 = vector.load %arg5[%c0_7, %c0_8] : memref<1x256xf32, #tpu.memory_space<vmem>>, vector<1x256xf32>
    %12 = vector.broadcast %11 : vector<1x256xf32> to vector<32x256xf32>
    %13 = arith.addf %10, %12 : vector<32x256xf32>
    %14 = arith.mulf %13, %13 : vector<32x256xf32>
    %15 = arith.mulf %13, %14 : vector<32x256xf32>
    %cst_9 = arith.constant 4.471500e-02 : f32
    %16 = vector.broadcast %cst_9 : f32 to vector<32x256xf32>
    %17 = arith.mulf %16, %15 : vector<32x256xf32>
    %18 = arith.addf %13, %17 : vector<32x256xf32>
    %cst_10 = arith.constant 0.797884583 : f32
    %19 = vector.broadcast %cst_10 : f32 to vector<32x256xf32>
    %20 = arith.mulf %19, %18 : vector<32x256xf32>
    %21 = math.tanh %20 : vector<32x256xf32>
    %cst_11 = arith.constant 1.000000e+00 : f32
    %22 = vector.broadcast %cst_11 : f32 to vector<32x256xf32>
    %23 = arith.addf %22, %21 : vector<32x256xf32>
    %cst_12 = arith.constant 5.000000e-01 : f32
    %24 = vector.broadcast %cst_12 : f32 to vector<32x256xf32>
    %25 = arith.mulf %24, %23 : vector<32x256xf32>
    %26 = arith.mulf %13, %25 : vector<32x256xf32>
    %c0_13 = arith.constant 0 : index
    %c0_14 = arith.constant 0 : index
    %27 = vector.load %arg11[%c0_13, %c0_14] : memref<32x128xf32, #tpu.memory_space<vmem>>, vector<32x128xf32>
    %28 = arith.truncf %26 : vector<32x256xf32> to vector<32x256xbf16>
    %c0_15 = arith.constant 0 : index
    %c0_16 = arith.constant 0 : index
    %29 = vector.load %arg6[%c0_15, %c0_16] : memref<256x128xbf16, #tpu.memory_space<vmem>>, vector<256x128xbf16>
    %cst_17 = arith.constant dense<0.000000e+00> : vector<32x128xf32>
    %30 = tpu.matmul %28, %29, %cst_17 {dimension_numbers = #tpu.dot_dimension_numbers<[1], [0], [0], [1], [0, 0, 1, 1], [], []>} : vector<32x256xbf16>, vector<256x128xbf16>, vector<32x128xf32> -> vector<32x128xf32>
    %31 = arith.addf %27, %30 : vector<32x128xf32>
    %c0_18 = arith.constant 0 : index
    %c0_19 = arith.constant 0 : index
    %32 = vector.load %arg11[%c0_18, %c0_19] : memref<32x128xf32, #tpu.memory_space<vmem>>, vector<32x128xf32>
    tpu.vector_store %arg11[%c0_18, %c0_19], %31 {strides = array<i32>} : memref<32x128xf32, #tpu.memory_space<vmem>>, vector<32x128xf32>,
    %c0_i32_20 = arith.constant 0 : i32
    %33 = arith.cmpi eq, %arg1, %c0_i32_20 : i32
    %34 = arith.extui %33 : i1 to i32
    %c0_i32_21 = arith.constant 0 : i32
    %35 = arith.cmpi ne, %34, %c0_i32_21 : i32
    scf.if %35 {
      %c0_22 = arith.constant 0 : index
      %c0_23 = arith.constant 0 : index
      %36 = vector.load %arg11[%c0_22, %c0_23] : memref<32x128xf32, #tpu.memory_space<vmem>>, vector<32x128xf32>
      %c0_24 = arith.constant 0 : index
      %c0_25 = arith.constant 0 : index
      %37 = vector.load %arg7[%c0_24, %c0_25] : memref<1x128xf32, #tpu.memory_space<vmem>>, vector<1x128xf32>
      %38 = vector.broadcast %37 : vector<1x128xf32> to vector<32x128xf32>
      %39 = arith.addf %36, %38 : vector<32x128xf32>
      %40 = arith.extf %8 : vector<32x128xbf16> to vector<32x128xf32>
      %41 = arith.addf %39, %40 : vector<32x128xf32>
      %42 = arith.truncf %41 : vector<32x128xf32> to vector<32x128xbf16>
      %c0_26 = arith.constant 0 : index
      %c0_27 = arith.constant 0 : index
      %43 = vector.load %arg8[%c0_26, %c0_27] : memref<32x128xbf16, #tpu.memory_space<vmem>>, vector<32x128xbf16>
      tpu.vector_store %arg8[%c0_26, %c0_27], %42 {strides = array<i32>} : memref<32x128xbf16, #tpu.memory_space<vmem>>, vector<32x128xbf16>,
      %c0_28 = arith.constant 0 : index
      %c0_29 = arith.constant 0 : index
      %44 = vector.load %arg3[%c0_28, %c0_29] : memref<32x128xbf16, #tpu.memory_space<vmem>>, vector<32x128xbf16>
      %45 = arith.extf %44 : vector<32x128xbf16> to vector<32x128xf32>
      %46 = arith.extf %42 : vector<32x128xbf16> to vector<32x128xf32>
      %47 = arith.subf %45, %46 : vector<32x128xf32>
      %48 = math.absf %47 : vector<32x128xf32>
      %49 = math.absf %45 : vector<32x128xf32>
      %c0_30 = arith.constant 0 : index
      %c0_31 = arith.constant 0 : index
      %50 = vector.load %arg9[%c0_30, %c0_31] : memref<1x1xf32, #tpu.memory_space<vmem>>, vector<1x1xf32>
      %51 = vector.shape_cast %48 : vector<32x128xf32> to vector<1x32x128xf32>
      %cst_32 = arith.constant dense<0.000000e+00> : vector<1xf32>
      %52 = vector.multi_reduction <add>, %51, %cst_32 [1, 2] : vector<1x32x128xf32> to vector<1xf32>
      %53 = vector.shape_cast %52 : vector<1xf32> to vector<1x1x1xf32>
      %54 = vector.extract %53[0, 0, 0] : f32 from vector<1x1x1xf32>
      %55 = vector.broadcast %54 : f32 to vector<1x1xf32>
      %56 = arith.addf %50, %55 : vector<1x1xf32>
      %c0_33 = arith.constant 0 : index
      %c0_34 = arith.constant 0 : index
      %57 = vector.load %arg9[%c0_33, %c0_34] : memref<1x1xf32, #tpu.memory_space<vmem>>, vector<1x1xf32>
      tpu.vector_store %arg9[%c0_33, %c0_34], %56 {strides = array<i32>} : memref<1x1xf32, #tpu.memory_space<vmem>>, vector<1x1xf32>,
      %c0_35 = arith.constant 0 : index
      %c0_36 = arith.constant 0 : index
      %58 = vector.load %arg10[%c0_35, %c0_36] : memref<1x1xf32, #tpu.memory_space<vmem>>, vector<1x1xf32>
      %59 = vector.shape_cast %49 : vector<32x128xf32> to vector<1x32x128xf32>
      %cst_37 = arith.constant dense<0.000000e+00> : vector<1xf32>
      %60 = vector.multi_reduction <add>, %59, %cst_37 [1, 2] : vector<1x32x128xf32> to vector<1xf32>
      %61 = vector.shape_cast %60 : vector<1xf32> to vector<1x1x1xf32>
      %62 = vector.extract %61[0, 0, 0] : f32 from vector<1x1x1xf32>
      %63 = vector.broadcast %62 : f32 to vector<1x1xf32>
      %64 = arith.addf %58, %63 : vector<1x1xf32>
      %c0_38 = arith.constant 0 : index
      %c0_39 = arith.constant 0 : index
      %65 = vector.load %arg10[%c0_38, %c0_39] : memref<1x1xf32, #tpu.memory_space<vmem>>, vector<1x1xf32>
      tpu.vector_store %arg10[%c0_38, %c0_39], %64 {strides = array<i32>} : memref<1x1xf32, #tpu.memory_space<vmem>>, vector<1x1xf32>,
    } else {
    }
    return
  }
  func.func @transform_0(%arg0: i32, %arg1: i32) -> (i32, i32) {
    %c0_i32 = arith.constant 0 : i32
    %c0_i32_0 = arith.constant 0 : i32
    return %arg0, %c0_i32 : i32, i32
  }
  func.func @transform_1(%arg0: i32, %arg1: i32) -> (i32, i32) {
    %c0_i32 = arith.constant 0 : i32
    %c0_i32_0 = arith.constant 0 : i32
    return %arg0, %c0_i32 : i32, i32
  }
  func.func @transform_2(%arg0: i32, %arg1: i32) -> (i32, i32) {
    %c0_i32 = arith.constant 0 : i32
    %c0_i32_0 = arith.constant 0 : i32
    return %c0_i32, %arg1 : i32, i32
  }
  func.func @transform_3(%arg0: i32, %arg1: i32) -> (i32, i32) {
    %c0_i32 = arith.constant 0 : i32
    %c0_i32_0 = arith.constant 0 : i32
    return %c0_i32, %arg1 : i32, i32
  }
  func.func @transform_4(%arg0: i32, %arg1: i32) -> (i32, i32) {
    %c0_i32 = arith.constant 0 : i32
    %c0_i32_0 = arith.constant 0 : i32
    return %arg1, %c0_i32 : i32, i32
  }
  func.func @transform_5(%arg0: i32, %arg1: i32) -> (i32, i32) {
    %c0_i32 = arith.constant 0 : i32
    %c0_i32_0 = arith.constant 0 : i32
    %c0_i32_1 = arith.constant 0 : i32
    return %c0_i32, %c0_i32_0 : i32, i32
  }
  func.func @transform_6(%arg0: i32, %arg1: i32) -> (i32, i32) {
    %c0_i32 = arith.constant 0 : i32
    %c0_i32_0 = arith.constant 0 : i32
    return %arg0, %c0_i32 : i32, i32
  }
  func.func @transform_7(%arg0: i32, %arg1: i32) -> (i32, i32) {
    %c0_i32 = arith.constant 0 : i32
    %c0_i32_0 = arith.constant 0 : i32
    %c0_i32_1 = arith.constant 0 : i32
    return %c0_i32, %c0_i32_0 : i32, i32
  }
  func.func @transform_8(%arg0: i32, %arg1: i32) -> (i32, i32) {
    %c0_i32 = arith.constant 0 : i32
    %c0_i32_0 = arith.constant 0 : i32
    %c0_i32_1 = arith.constant 0 : i32
    return %c0_i32, %c0_i32_0 : i32, i32
  }
}

</mosaic_0001>

<bundles_post_ra>
// kernel: tpu_custom_call.1
= control target key start
LH: loop header
LB: loop body
LE: loop exit
PB: predicated region body
PF: predicated region fallthrough
CT: control target
= control target key end

     0   :  { %14 = vsyncpa [#allocation4], 0  ;;  %s1260_s0 = inlined_call_operand.hbm [shape: bf16[32,128], index: 0, kind: input, shape index: {}]   ;;  %s1261_s1 = inlined_call_operand.hbm [shape: bf16[32,128], index: 1, kind: input, shape index: {}]   ;;  %s1262_s2 = inlined_call_operand.hbm [shape: bf16[128,256], index: 2, kind: input, shape index: {}]   ;;  %s1263_s3 = inlined_call_operand.vmem [shape: f32[1,256], index: 3, kind: input, shape index: {}]   ;;  %s1264_s4 = inlined_call_operand.hbm [shape: bf16[256,128], index: 4, kind: input, shape index: {}]   ;;  %s1265_s5 = inlined_call_operand.vmem [shape: f32[1,128], index: 5, kind: input, shape index: {}]   ;;  %s1266_s6 = inlined_call_operand.hbm [shape: bf16[32,128], index: 6, kind: output, shape index: {0}]   ;;  %s1267_s7 = inlined_call_operand.hbm [shape: f32[1,1], index: 7, kind: output, shape index: {1}]   ;;  %s1268_s8 = inlined_call_operand.hbm [shape: f32[1,1], index: 8, kind: output, shape index: {2}]  }
   0x1   :  { %15 = vsyncpa [#allocation7], 0 }
   0x2   :  { %16 = vsyncpa [#allocation10], 0 }
   0x3   :  { %17 = vsyncpa [#allocation5], 0 }
   0x4   :  { %18 = vsyncpa [#allocation13], 0  ;;  %s1023_s27 = smov [#allocation6]   ;;  %s1024_s29 = smov [#allocation3]  }
   0x5   :  { %s36_s28 = sshll.u32 %s1023_s27, 4  ;;  %s24_s30 = sshll.u32 %s1024_s29, 4  ;;  %s37_s28 = int_to_ptr.vmem [resolvable:$true] %s36_s28  ;;  %s1081_s30 = int_to_ptr.vmem [resolvable:$true] %s24_s30 }
   0x6   :  { %s859_s11 = scalar_lea.hbm %s1261_s1, 256 }
   0x7   :  { %p860_p0 = scmp.ne.s32.totalorder %s1261_s1, %s859_s11  ;;  %p863_p1 = scmp.lt.u32.totalorder %s859_s11, %s1261_s1 }
   0x9   :  { %p865_p2 = pnand %p863_p1, %p860_p0 }
   0xb   :  { %868 = shalt.err (!%p865_p2)
}
   0xc   :  { %s869_s16 = scalar_lea.vmem %s37_s28, 256  ;;  %p874_p4 = scmp.lt.s32.totalorder %s37_s28, %s37_s28 }
   0xd   :  { %p870_p3 = scmp.ne.s32.totalorder %s37_s28, %s869_s16  ;;  %p875_p5 = scmp.lt.s32.totalorder %s869_s16, %s869_s16 }
   0xf   :  { %p876_p6 = por %p875_p5, %p874_p4 }
  0x11   :  { %p877_p7 = pnand %p876_p6, %p870_p3 }
  0x13   :  { %880 = shalt.err (!%p877_p7)
}
  0x14   :  { %s1025_s17 = smov 64   ;;  %s1026_s18 = smov 4  }
  0x15   :  { %42 = dma.hbm_to_vmem [thread:$0]  %s1261_s1, 256, %s37_s28, [#allocation7], %s1025_s17, %s1025_s17, %s1026_s18  }
  0x16   :  { %s881_s23 = scalar_lea.hbm %s1260_s0, 256 }
  0x17   :  { %p882_p8 = scmp.ne.s32.totalorder %s1260_s0, %s881_s23  ;;  %p885_p9 = scmp.lt.u32.totalorder %s881_s23, %s1260_s0 }
  0x19   :  { %p887_p10 = pnand %p885_p9, %p882_p8 }
  0x1b   :  { %890 = shalt.err (!%p887_p10)
}
  0x1c   :  { %s891_s29 = scalar_lea.vmem %s1081_s30, 256  ;;  %p896_p12 = scmp.lt.s32.totalorder %s1081_s30, %s1081_s30 }
  0x1d   :  { %p892_p11 = scmp.ne.s32.totalorder %s1081_s30, %s891_s29  ;;  %p897_p13 = scmp.lt.s32.totalorder %s891_s29, %s891_s29 }
  0x1f   :  { %p898_p0 = por %p897_p13, %p896_p12 }
  0x21   :  { %p899_p1 = pnand %p898_p0, %p892_p11 }
  0x23   :  { %902 = shalt.err (!%p899_p1)
}
  0x24   :  { %30 = dma.hbm_to_vmem [thread:$0]  %s1260_s0, 256, %s1081_s30, [#allocation4], %s1025_s17, %s1025_s17, %s1026_s18  }
  0x25   :  { %s1027_s9 = smov [#allocation8]   ;;  %s903_s13 = scalar_lea.hbm %s1262_s2, 2048 }
  0x26   :  { %s48_s10 = sshll.u32 %s1027_s9, 4  ;;  %p904_p2 = scmp.ne.s32.totalorder %s1262_s2, %s903_s13  ;;  %s49_s10 = int_to_ptr.vmem [resolvable:$true] %s48_s10 }
  0x27   :  { %p907_p3 = scmp.lt.u32.totalorder %s903_s13, %s1262_s2 }
  0x29   :  { %p909_p4 = pnand %p907_p3, %p904_p2 }
  0x2b   :  { %912 = shalt.err (!%p909_p4)
}
  0x2c   :  { %s913_s20 = scalar_lea.vmem %s49_s10, 2048  ;;  %p918_p6 = scmp.lt.s32.totalorder %s49_s10, %s49_s10 }
  0x2d   :  { %p914_p5 = scmp.ne.s32.totalorder %s49_s10, %s913_s20  ;;  %p919_p7 = scmp.lt.s32.totalorder %s913_s20, %s913_s20 }
  0x2f   :  { %p920_p8 = por %p919_p7, %p918_p6 }
  0x31   :  { %p921_p9 = pnand %p920_p8, %p914_p5 }
  0x33   :  { %924 = shalt.err (!%p921_p9)
}
  0x34   :  { %s1028_s0 = smov 128   ;;  %s1029_s30 = smov 8  }
  0x35   :  { %54 = dma.hbm_to_vmem [thread:$0]  %s1262_s2, 2048, %s49_s10, [#allocation7], %s1028_s0, %s1028_s0, %s1029_s30  }
  0x36   :  { %s1030_s23 = smov [#allocation9]   ;;  %s925_s27 = scalar_lea.hbm %s1264_s4, 2048 }
  0x37   :  { %s62_s24 = sshll.u32 %s1030_s23, 4  ;;  %p926_p10 = scmp.ne.s32.totalorder %s1264_s4, %s925_s27  ;;  %s63_s24 = int_to_ptr.vmem [resolvable:$true] %s62_s24 }
  0x38   :  { %p929_p11 = scmp.lt.u32.totalorder %s925_s27, %s1264_s4 }
  0x3a   :  { %p931_p12 = pnand %p929_p11, %p926_p10 }
  0x3c   :  { %934 = shalt.err (!%p931_p12)
}
  0x3d   :  { %s935_s11 = scalar_lea.vmem %s63_s24, 2048  ;;  %p940_p0 = scmp.lt.s32.totalorder %s63_s24, %s63_s24 }
  0x3e   :  { %p936_p13 = scmp.ne.s32.totalorder %s63_s24, %s935_s11  ;;  %p941_p1 = scmp.lt.s32.totalorder %s935_s11, %s935_s11 }
  0x40   :  { %p942_p2 = por %p941_p1, %p940_p0 }
  0x42   :  { %p943_p3 = pnand %p942_p2, %p936_p13 }
  0x44   :  { %946 = shalt.err (!%p943_p3)
}
  0x45   :  { %68 = dma.hbm_to_vmem [thread:$0]  %s1264_s4, 2048, %s63_s24, [#allocation10], %s1025_s17, %s1025_s17, %s1026_s18  }
  0x46   :  { %1013 = dma.done.wait [#allocation4], 256  }
  0x47   :  { %1014 = vsyncadd [#allocation4], 4294967040 }
  0x48   :  { %1015 = dma.done.wait [#allocation7], 2304  }
  0x49   :  { %1016 = vsyncadd [#allocation7], 4294964992 }
  0x4a   :  { %1017 = dma.done.wait [#allocation10], 2048  }
  0x4b   :  { %1018 = vsyncadd [#allocation10], 4294965248  ;;  %v1031_v0 = vmov 0   ;;  %v799_v1 = vld [vmem:[#allocation8 + $0x4] ss:$8 sps:$4 sm:$0xff]   ;;  %v829_v23 = vld [vmem:[#allocation9 + $0x50] sm:$0xff]   ;;  %v122_v35 = vlaneseq }
  0x4c   :  { %256 = vmatprep.mubr.bf16.mxu0 %v1031_v0  ;;  %v801_v2 = vld [vmem:[#allocation8] ss:$8 sps:$4 sm:$0xff]   ;;  %224 = vmatprep.subr.bf16.mxu0 %v799_v1  ;;  %v802_v3 = vld [vmem:[#allocation8 + $0x14] ss:$8 sps:$4 sm:$0xff]   ;;  %v804_v4 = vld [vmem:[#allocation8 + $0x10] ss:$8 sps:$4 sm:$0xff]  }
  0x4d   :  { %225 = vmatpush1.bf16.msra.mxu0 %v801_v2  ;;  %v805_v5 = vld [vmem:[#allocation8 + $0x24] ss:$8 sps:$4 sm:$0xff]   ;;  %v807_v6 = vld [vmem:[#allocation8 + $0x20] ss:$8 sps:$4 sm:$0xff]   ;;  %v808_v7 = vld [vmem:[#allocation8 + $0x34] ss:$8 sps:$4 sm:$0xff]  }
  0x4e   :  { %226 = vmatprep.subr.bf16.mxu0 %v802_v3  ;;  %v810_v8 = vld [vmem:[#allocation8 + $0x30] ss:$8 sps:$4 sm:$0xff]   ;;  %v811_v9 = vld [vmem:[#allocation8 + $0x44] ss:$8 sps:$4 sm:$0xff]   ;;  %v813_v10 = vld [vmem:[#allocation8 + $0x40] ss:$8 sps:$4 sm:$0xff]  }
  0x4f   :  { %v814_v11 = vld [vmem:[#allocation8 + $0x54] ss:$8 sps:$4 sm:$0xff]   ;;  %v816_v12 = vld [vmem:[#allocation8 + $0x50] ss:$8 sps:$4 sm:$0xff]   ;;  %v817_v13 = vld [vmem:[#allocation8 + $0x64] ss:$8 sps:$4 sm:$0xff]  }
  0x50   :  { %v819_v14 = vld [vmem:[#allocation8 + $0x60] ss:$8 sps:$4 sm:$0xff]   ;;  %v820_v15 = vld [vmem:[#allocation8 + $0x74] ss:$8 sps:$4 sm:$0xff]   ;;  %v822_v16 = vld [vmem:[#allocation8 + $0x70] ss:$8 sps:$4 sm:$0xff]  }
  0x51   :  { %227 = vmatpush1.bf16.msra.mxu0 %v804_v4  ;;  %v1145_v17 = vld [vmem:[#allocation3] sm:$0xff]   ;;  %v1148_v18 = vld [vmem:[#allocation3 + $0x8] sm:$0xff]   ;;  %v830_v24 = vld [vmem:[#allocation9 + $0x10] sm:$0xff]   ;;  %v123_v36 = vshrl.u32 %v122_v35, 7  ;;  %vm90_vm0 = vcmask 0  }
  0x52   :  { %228 = vmatprep.subr.bf16.mxu0 %v805_v5  ;;  %v825_v19 = vld [vmem:[#allocation9 + $0x40] sm:$0xff]   ;;  %v827_v21 = vld [vmem:[#allocation9 + $0x48] sm:$0xff]   ;;  %v831_v25 = vld [vmem:[#allocation9 + $0x58] sm:$0xff]  }
  0x53   :  { %v826_v20 = vld [vmem:[#allocation9] sm:$0xff]   ;;  %754 = vmatprep.subr.bf16.mxu1 %v825_v19  ;;  %v828_v22 = vld [vmem:[#allocation9 + $0x8] sm:$0xff]   ;;  %v832_v26 = vld [vmem:[#allocation9 + $0x18] sm:$0xff]   ;;  %v124_v37 = vsub.s32 0, %v123_v36  ;;  %v128_v39 = vsub.s32 1, %v123_v36 }
  0x54   :  { %755 = vmatpush3.bf16.msra.mxu1 %v826_v20  ;;  %v833_v27 = vld [vmem:[#allocation9 + $0x60] sm:$0xff]   ;;  %v835_v29 = vld [vmem:[#allocation9 + $0x68] sm:$0xff]   ;;  %v837_v31 = vld [vmem:[#allocation9 + $0x70] sm:$0xff]  }
  0x55   :  { %229 = vmatpush1.bf16.msra.mxu0 %v807_v6  ;;  %756 = vmatprep.subr.bf16.mxu1 %v827_v21  ;;  %v834_v28 = vld [vmem:[#allocation9 + $0x20] sm:$0xff]   ;;  %v836_v30 = vld [vmem:[#allocation9 + $0x28] sm:$0xff]   ;;  %v838_v32 = vld [vmem:[#allocation9 + $0x30] sm:$0xff]  }
  0x56   :  { %230 = vmatprep.subr.bf16.mxu0 %v808_v7  ;;  %v839_v33 = vld [vmem:[#allocation9 + $0x78] sm:$0xff]   ;;  %v120_v38 = vld [vmem:[%s1263_s3] sm:$0x3] }
  0x57   :  { %v840_v34 = vld [vmem:[#allocation9 + $0x38] sm:$0xff]   ;;  %v125_v40 = vrot.slane %v120_v38, %v124_v37  ;;  %v129_v41 = vrot.slane %v120_v38, %v128_v39 }
  0x58   :  { %757 = vmatpush3.bf16.msra.mxu1 %v828_v22 }
  0x59   :  { %231 = vmatpush1.bf16.msra.mxu0 %v810_v8  ;;  %758 = vmatprep.subr.bf16.mxu1 %v829_v23 }
  0x5a   :  { %232 = vmatprep.subr.bf16.mxu0 %v811_v9 }
  0x5c   :  { %759 = vmatpush3.bf16.msra.mxu1 %v830_v24 }
  0x5d   :  { %233 = vmatpush1.bf16.msra.mxu0 %v813_v10  ;;  %760 = vmatprep.subr.bf16.mxu1 %v831_v25 }
  0x5e   :  { %234 = vmatprep.subr.bf16.mxu0 %v814_v11 }
  0x60   :  { %761 = vmatpush3.bf16.msra.mxu1 %v832_v26 }
  0x61   :  { %235 = vmatpush1.bf16.msra.mxu0 %v816_v12  ;;  %762 = vmatprep.subr.bf16.mxu1 %v833_v27 }
  0x62   :  { %236 = vmatprep.subr.bf16.mxu0 %v817_v13 }
  0x64   :  { %763 = vmatpush3.bf16.msra.mxu1 %v834_v28 }
  0x65   :  { %237 = vmatpush1.bf16.msra.mxu0 %v819_v14  ;;  %764 = vmatprep.subr.bf16.mxu1 %v835_v29 }
  0x66   :  { %238 = vmatprep.subr.bf16.mxu0 %v820_v15 }
  0x68   :  { %765 = vmatpush3.bf16.msra.mxu1 %v836_v30 }
  0x69   :  { %239 = vmatpush1.bf16.msra.mxu0 %v822_v16  ;;  %766 = vmatprep.subr.bf16.mxu1 %v837_v31 }
  0x6c   :  { %257 = vmatmul.mubr.bf16.vlgmr.msra.gmra.mrb[0].mxu0 %v1145_v17  ;;  %767 = vmatpush3.bf16.msra.mxu1 %v838_v32 }
  0x6d   :  { %266 = vmatprep.mubr.bf16.mxu0 %v1031_v0  ;;  %768 = vmatprep.subr.bf16.mxu1 %v839_v33 }
  0x70   :  { %769 = vmatpush3.bf16.msra.mxu1 %v840_v34 }
  0x74   :  { %267 = vmatmul.mubr.bf16.gmra.mrb[4].mxu0 %v1148_v18 }
 0x13f   :  { %v258_v42 = vpop.f32.mrb[0].mxu0 }
 0x140   :  { %v1154_v43 = vadd.f32 %v258_v42, %v125_v40  ;;  %v260_v44 = vpop.f32.mrb[1].mxu0 }
 0x141   :  { %v1156_v45 = vadd.f32 %v260_v44, %v129_v41  ;;  %v262_v46 = vpop.f32.mrb[2].mxu0 }
 0x142   :  { %v277_v47 = vmul.f32 %v1154_v43, %v1154_v43  ;;  %v1160_v48 = vadd.f32 %v262_v46, %v125_v40  ;;  %v264_v49 = vpop.f32.mrb[3].mxu0 }
 0x143   :  { %v278_v50 = vmul.f32 %v1156_v45, %v1156_v45  ;;  %v1164_v51 = vadd.f32 %v264_v49, %v129_v41 }
 0x144   :  { %v285_v52 = vmul.f32 %v277_v47, %v1154_v43  ;;  %v279_v53 = vmul.f32 %v1160_v48, %v1160_v48 }
 0x145   :  { %v286_v54 = vmul.f32 %v278_v50, %v1156_v45  ;;  %v280_v55 = vmul.f32 %v1164_v51, %v1164_v51 }
 0x146   :  { %v293_v56 = vmul.f32 0.044715, %v285_v52  ;;  %v287_v57 = vmul.f32 %v279_v53, %v1160_v48 }
 0x147   :  { %v294_v58 = vmul.f32 0.044715, %v286_v54  ;;  %v288_v59 = vmul.f32 %v280_v55, %v1164_v51  ;;  %v268_v60 = vpop.f32.mrb[4].mxu0 }
 0x148   :  { %v301_v61 = vadd.f32 %v293_v56, %v1154_v43  ;;  %v295_v62 = vmul.f32 0.044715, %v287_v57  ;;  %v1175_v63 = vadd.f32 %v268_v60, %v125_v40  ;;  %v270_v0 = vpop.f32.mrb[5].mxu0 }
 0x149   :  { %v296_v1 = vmul.f32 0.044715, %v288_v59  ;;  %v1177_v2 = vadd.f32 %v270_v0, %v129_v41  ;;  %v272_v3 = vpop.f32.mrb[6].mxu0  ;;  %v302_v4 = vadd.f32 %v294_v58, %v1156_v45 }
 0x14a   :  { %v309_v5 = vmul.f32 0.7978846, %v301_v61  ;;  %v303_v6 = vadd.f32 %v295_v62, %v1160_v48  ;;  %v281_v7 = vmul.f32 %v1175_v63, %v1175_v63  ;;  %v1183_v8 = vadd.f32 %v272_v3, %v125_v40  ;;  %v274_v9 = vpop.f32.mrb[7].mxu0 }
 0x14b   :  { %v282_v10 = vmul.f32 %v1177_v2, %v1177_v2  ;;  %v1187_v11 = vadd.f32 %v274_v9, %v129_v41  ;;  %v304_v12 = vadd.f32 %v296_v1, %v1164_v51  ;;  %v310_v13 = vmul.f32 0.7978846, %v302_v4 }
 0x14c   :  { %843 = vtanh.f32 %v309_v5  ;;  %v311_v14 = vmul.f32 0.7978846, %v303_v6  ;;  %v289_v15 = vmul.f32 %v281_v7, %v1175_v63  ;;  %v283_v16 = vmul.f32 %v1183_v8, %v1183_v8 }
 0x14d   :  { %v290_v19 = vmul.f32 %v282_v10, %v1177_v2  ;;  %v284_v20 = vmul.f32 %v1187_v11, %v1187_v11  ;;  %v312_v21 = vmul.f32 0.7978846, %v304_v12  ;;  %845 = vtanh.f32 %v310_v13 }
 0x14e   :  { %847 = vtanh.f32 %v311_v14  ;;  %v297_v22 = vmul.f32 0.044715, %v289_v15  ;;  %v291_v23 = vmul.f32 %v283_v16, %v1183_v8  ;;  %v725_v14 = vld [vmem:[%s1265_s5] ss:$0 sm:$0xff]  ;;  %v560_v15 = vunpack.c.l.bf16 %v1145_v17  ;;  %s1033_s5 = smov [#allocation11]  }
 0x14f   :  { %v298_v24 = vmul.f32 0.044715, %v290_v19  ;;  %v292_v25 = vmul.f32 %v284_v20, %v1187_v11  ;;  %849 = vtanh.f32 %v312_v21  ;;  %s650_s14 = sshll.u32 %s1033_s5, 4  ;;  %s651_s14 = int_to_ptr.vmem [resolvable:$true] %s650_s14 }
 0x150   :  { %v305_v26 = vadd.f32 %v297_v22, %v1175_v63  ;;  %v299_v27 = vmul.f32 0.044715, %v291_v23  ;;  %s947_s15 = scalar_lea.vmem %s651_s14, 256  ;;  %p952_p5 = scmp.lt.s32.totalorder %s651_s14, %s651_s14 }
 0x151   :  { %v306_v28 = vadd.f32 %v298_v24, %v1177_v2  ;;  %v300_v29 = vmul.f32 0.044715, %v292_v25  ;;  %v745_v24 = vld [vmem:[#allocation6] sm:$0xff]   ;;  %p948_p4 = scmp.ne.s32.totalorder %s651_s14, %s947_s15  ;;  %p953_p6 = scmp.lt.s32.totalorder %s947_s15, %s947_s15 }
 0x152   :  { %v313_v30 = vmul.f32 0.7978846, %v305_v26  ;;  %v307_v31 = vadd.f32 %v299_v27, %v1183_v8  ;;  %v562_v26 = vunpack.c.l.bf16 %v1148_v18 }
 0x153   :  { %v314_v32 = vmul.f32 0.7978846, %v306_v28  ;;  %v308_v33 = vadd.f32 %v300_v29, %v1187_v11  ;;  %p954_p7 = por %p953_p6, %p952_p5 }
 0x154   :  { %851 = vtanh.f32 %v313_v30  ;;  %v315_v34 = vmul.f32 0.7978846, %v307_v31  ;;  %v563_v30 = vunpack.c.h.bf16 %v1148_v18 }
 0x155   :  { %853 = vtanh.f32 %v314_v32  ;;  %v316_v35 = vmul.f32 0.7978846, %v308_v33  ;;  %v746_v32 = vunpack.c.l.bf16 %v745_v24  ;;  %v747_v33 = vunpack.c.h.bf16 %v745_v24  ;;  %p955_p8 = pnand %p954_p7, %p948_p4 }
 0x156   :  { %v844_v36 = vpop.eup %843  ;;  %855 = vtanh.f32 %v315_v34 }
 0x157   :  { %v846_v37 = vpop.eup %845  ;;  %857 = vtanh.f32 %v316_v35  ;;  %v325_v38 = vadd.f32 1.0, %v844_v36 }
 0x158   :  { %v848_v39 = vpop.eup %847  ;;  %v326_v40 = vadd.f32 1.0, %v846_v37 }
 0x159   :  { %v850_v41 = vpop.eup %849  ;;  %v327_v42 = vadd.f32 1.0, %v848_v39  ;;  %v333_v44 = vmul.f32 0.5, %v325_v38  ;;  %v753_v39 = vld [vmem:[#allocation6 + $0x8] sm:$0xff]  }
 0x15a   :  { %v328_v46 = vadd.f32 1.0, %v850_v41  ;;  %v334_v47 = vmul.f32 0.5, %v326_v40 }
 0x15b   :  { %v335_v49 = vmul.f32 0.5, %v327_v42  ;;  %v341_v52 = vmul.f32 %v333_v44, %v1154_v43  ;;  %v750_v44 = vunpack.c.l.bf16 %v753_v39 }
 0x15c   :  { %v336_v50 = vmul.f32 0.5, %v328_v46  ;;  %v342_v55 = vmul.f32 %v334_v47, %v1156_v45  ;;  %v751_v47 = vunpack.c.h.bf16 %v753_v39 }
 0x15d   :  { %v343_v53 = vmul.f32 %v335_v49, %v1160_v48  ;;  %v608_v49 = vand.u32 2147483647, %v746_v32 }
 0x15e   :  { %v852_v54 = vpop.eup %851  ;;  %v344_v56 = vmul.f32 %v336_v50, %v1164_v51  ;;  %v609_v50 = vand.u32 2147483647, %v747_v33 }
 0x15f   :  { %v854_v57 = vpop.eup %853  ;;  %v353_v58 = vpack.c.bf16 %v343_v53, %v341_v52  ;;  %v329_v59 = vadd.f32 1.0, %v852_v54 }
 0x160   :  { %v856_v60 = vpop.eup %855  ;;  %v354_v61 = vpack.c.bf16 %v344_v56, %v342_v55  ;;  %v330_v62 = vadd.f32 1.0, %v854_v57  ;;  %v610_v57 = vand.u32 2147483647, %v750_v44 }
 0x161   :  { %v858_v0 = vpop.eup %857  ;;  %v331_v1 = vadd.f32 1.0, %v856_v60  ;;  %v337_v3 = vmul.f32 0.5, %v329_v59 }
 0x162   :  { %517 = vmatprep.mubr.bf16.mxu1 %v354_v61  ;;  %v332_v4 = vadd.f32 1.0, %v858_v0  ;;  %v338_v5 = vmul.f32 0.5, %v330_v62  ;;  %v611_v0 = vand.u32 2147483647, %v751_v47 }
 0x163   :  { %518 = vmatmul.mubr.bf16.vlgmr.msra.gmra.mrb[0].mxu1 %v353_v58  ;;  %v339_v43 = vmul.f32 0.5, %v331_v1  ;;  %v345_v6 = vmul.f32 %v337_v3, %v1175_v63  ;;  %v630_v58 = vadd.f32 %v609_v50, %v608_v49 }
 0x164   :  { %v340_v48 = vmul.f32 0.5, %v332_v4  ;;  %v346_v51 = vmul.f32 %v338_v5, %v1177_v2  ;;  %v1032_v5 = vmov 0.0  }
 0x165   :  { %v347_v45 = vmul.f32 %v339_v43, %v1183_v8  ;;  %v561_v8 = vunpack.c.h.bf16 %v1145_v17  ;;  %v631_v1 = vadd.f32 %v630_v58, %v610_v57  ;;  %91 = vst.msk [vmem:[#allocation12] sm:$0x1] %vm90_vm0, %v1032_v5  ;;  %92 = vst.msk [vmem:[#allocation14] sm:$0x1] %vm90_vm0, %v1032_v5 }
 0x166   :  { %v348_v7 = vmul.f32 %v340_v48, %v1187_v11 }
 0x167   :  { %v355_v9 = vpack.c.bf16 %v347_v45, %v345_v6  ;;  %v632_v4 = vadd.f32 %v631_v1, %v611_v0 }
 0x168   :  { %v356_v10 = vpack.c.bf16 %v348_v7, %v346_v51 }
 0x16a   :  { %525 = vmatprep.mubr.bf16.mxu1 %v356_v10 }
 0x16b   :  { %526 = vmatmul.mubr.bf16.gmra.mrb[4].mxu1 %v355_v9 }
 0x236   :  { %v770_v12 = vpop.f32.mrb[0].mxu1 }
 0x237   :  { %v771_v13 = vpop.f32.mrb[1].mxu1 }
 0x238   :  { %v772_v16 = vadd.f32 %v771_v13, %v770_v12  ;;  %v773_v63 = vpop.f32.mrb[2].mxu1 }
 0x239   :  { %v774_v19 = vpop.f32.mrb[3].mxu1 }
 0x23a   :  { %v556_v2 = vadd.f32 %v772_v16, %v725_v14  ;;  %v775_v20 = vadd.f32 %v774_v19, %v773_v63 }
 0x23c   :  { %v564_v11 = vadd.f32 %v560_v15, %v556_v2  ;;  %v557_v21 = vadd.f32 %v775_v20, %v725_v14 }
 0x23e   :  { %v565_v22 = vadd.f32 %v561_v8, %v557_v21  ;;  %v776_v23 = vpop.f32.mrb[4].mxu1 }
 0x23f   :  { %v777_v25 = vpop.f32.mrb[5].mxu1 }
 0x240   :  { %v568_v27 = vpack.c.bf16 %v565_v22, %v564_v11  ;;  %v778_v28 = vadd.f32 %v777_v25, %v776_v23  ;;  %v779_v29 = vpop.f32.mrb[6].mxu1 }
 0x241   :  { %v780_v31 = vpop.f32.mrb[7].mxu1 }
 0x242   :  { %738 = vst [vmem:[#allocation11] sm:$0xff] %v568_v27   ;;  %v558_v17 = vadd.f32 %v778_v28, %v725_v14  ;;  %v781_v34 = vadd.f32 %v780_v31, %v779_v29  ;;  %v596_v35 = vunpack.c.l.bf16 %v568_v27  ;;  %v597_v36 = vunpack.c.h.bf16 %v568_v27 }
 0x244   :  { %v566_v37 = vadd.f32 %v562_v26, %v558_v17  ;;  %v559_v38 = vadd.f32 %v781_v34, %v725_v14  ;;  %v600_v41 = vsub.f32 %v746_v32, %v596_v35  ;;  %v601_v42 = vsub.f32 %v747_v33, %v597_v36 }
 0x246   :  { %v567_v40 = vadd.f32 %v563_v30, %v559_v38  ;;  %v604_v53 = vand.u32 2147483647, %v600_v41  ;;  %v605_v54 = vand.u32 2147483647, %v601_v42 }
 0x248   :  { %v569_v46 = vpack.c.bf16 %v567_v40, %v566_v37  ;;  %v613_v60 = vadd.f32 %v605_v54, %v604_v53 }
 0x24a   :  { %752 = vst [vmem:[#allocation11 + $0x8] sm:$0xff] %v569_v46   ;;  %v598_v18 = vunpack.c.l.bf16 %v569_v46  ;;  %v599_v52 = vunpack.c.h.bf16 %v569_v46 }
 0x24c   :  { %v602_v55 = vsub.f32 %v750_v44, %v598_v18  ;;  %v603_v56 = vsub.f32 %v751_v47, %v599_v52 }
 0x24e   :  { %v606_v59 = vand.u32 2147483647, %v602_v55  ;;  %v607_v61 = vand.u32 2147483647, %v603_v56 }
 0x250   :  { %v614_v62 = vadd.f32 %v613_v60, %v606_v59 }
 0x252   :  { %v615_v3 = vadd.f32 %v614_v62, %v607_v61 }
 0x254   :  { %616 = vadd.xlane.f32.xlu0 %v615_v3 }
 0x258   :  { %633 = vadd.xlane.f32.xlu0 %v632_v4 }
 0x259   :  { %958 = shalt.err (!%p955_p8)
}
 0x25a   :  { %s959_s20 = scalar_lea.hbm %s1266_s6, 256 }
 0x25b   :  { %p960_p9 = scmp.ne.s32.totalorder %s1266_s6, %s959_s20  ;;  %p963_p10 = scmp.lt.u32.totalorder %s959_s20, %s1266_s6 }
 0x25d   :  { %p965_p11 = pnand %p963_p10, %p960_p9 }
 0x25f   :  { %968 = shalt.err (!%p965_p11)
}
 0x260   :  { %656 = dma.vmem_to_hbm [thread:$0]  %s651_s14, 256, %s1266_s6, [#allocation5], %s1025_s17, %s1025_s17, %s1026_s18   ;;  %v612_v19 = vld [vmem:[#allocation12] sm:$0x1]  ;;  %v629_v20 = vld [vmem:[#allocation14] sm:$0x1] }
 0x261   :  { %s1034_s25 = smov [#allocation12]   ;;  %s1035_s17 = smov [#allocation14]  }
 0x262   :  { %s663_s26 = sshll.u32 %s1034_s25, 4  ;;  %s673_s18 = sshll.u32 %s1035_s17, 4  ;;  %s664_s26 = int_to_ptr.vmem [resolvable:$true] %s663_s26  ;;  %s674_s18 = int_to_ptr.vmem [resolvable:$true] %s673_s18 }
 0x263   :  { %s969_s29 = scalar_lea.vmem %s664_s26, 16  ;;  %s973_s1 = scalar_lea.vmem %s664_s26, 32 }
 0x264   :  { %p970_p12 = scmp.ne.s32.totalorder %s664_s26, %s969_s29  ;;  %p974_p13 = scmp.lt.s32.totalorder %s664_s26, %s664_s26 }
 0x265   :  { %p975_p0 = scmp.lt.s32.totalorder %s973_s1, %s969_s29 }
 0x267   :  { %p976_p1 = por %p975_p0, %p974_p13 }
 0x269   :  { %p977_p2 = pnand %p976_p1, %p970_p12 }
 0x2e1   :  { %v617_v43 = vpop.xlane.xlu0 %616 }
 0x2e2   :  { %v618_v48 = vrot.slane %v617_v43, 4 }
 0x2e4   :  { %v619_v6 = vadd.f32 %v618_v48, %v617_v43 }
 0x2e5   :  { %v634_v45 = vpop.xlane.xlu0 %633 }
 0x2e6   :  { %v620_v51 = vrot.slane %v619_v6, 2  ;;  %v635_v7 = vrot.slane %v634_v45, 4 }
 0x2e8   :  { %v636_v9 = vadd.f32 %v635_v7, %v634_v45  ;;  %v621_v10 = vadd.f32 %v620_v51, %v619_v6 }
 0x2ea   :  { %v637_v12 = vrot.slane %v636_v9, 2  ;;  %v622_v13 = vrot.slane %v621_v10, 1 }
 0x2ec   :  { %v638_v14 = vadd.f32 %v637_v12, %v636_v9  ;;  %v623_v15 = vadd.f32 %v622_v13, %v621_v10 }
 0x2ee   :  { %782 = vpush %v623_v15  ;;  %v639_v16 = vrot.slane %v638_v14, 1 }
 0x2f0   :  { %v640_v63 = vadd.f32 %v639_v16, %v638_v14 }
 0x2f2   :  { %784 = vpush %v640_v63 }
 0x31f   :  { %s783_s6 = spop %782 }
 0x320   :  { %v625_v8 = vstv %s783_s6 }
 0x321   :  { %v626_v2 = vadd.f32 %v625_v8, %v612_v19 }
 0x323   :  { %628 = vst.msk [vmem:[#allocation12] sm:$0x1] %vm90_vm0, %v626_v2  ;;  %s785_s27 = spop %784 }
 0x324   :  { %v642_v11 = vstv %s785_s27 }
 0x325   :  { %980 = shalt.err (!%p977_p2)
}
 0x326   :  { %s981_s11 = scalar_lea.hbm %s1267_s7, 16 }
 0x327   :  { %p982_p3 = scmp.ne.s32.totalorder %s1267_s7, %s981_s11  ;;  %p985_p4 = scmp.lt.u32.totalorder %s981_s11, %s1267_s7 }
 0x329   :  { %p987_p5 = pnand %p985_p4, %p982_p3 }
 0x32b   :  { %990 = shalt.err (!%p987_p5)
}
 0x32c   :  { %666 = dma.vmem_to_hbm [thread:$0]  %s664_s26, 16, %s1267_s7, [#allocation13]   ;;  %v643_v21 = vadd.f32 %v642_v11, %v629_v20 }
 0x32d   :  { %s991_s5 = scalar_lea.vmem %s674_s18, 16  ;;  %s995_s14 = scalar_lea.vmem %s674_s18, 32 }
 0x32e   :  { %644 = vst.msk [vmem:[#allocation14] sm:$0x1] %vm90_vm0, %v643_v21  ;;  %p992_p6 = scmp.ne.s32.totalorder %s674_s18, %s991_s5  ;;  %p996_p7 = scmp.lt.s32.totalorder %s674_s18, %s674_s18 }
 0x32f   :  { %p997_p8 = scmp.lt.s32.totalorder %s995_s14, %s991_s5 }
 0x331   :  { %p998_p9 = por %p997_p8, %p996_p7 }
 0x333   :  { %p999_p10 = pnand %p998_p9, %p992_p6 }
 0x335   :  { %1002 = shalt.err (!%p999_p10)
}
 0x336   :  { %s1003_s19 = scalar_lea.hbm %s1268_s8, 16 }
 0x337   :  { %p1004_p11 = scmp.ne.s32.totalorder %s1268_s8, %s1003_s19  ;;  %p1007_p12 = scmp.lt.u32.totalorder %s1003_s19, %s1268_s8 }
 0x339   :  { %p1009_p13 = pnand %p1007_p12, %p1004_p11 }
 0x33b   :  { %1012 = shalt.err (!%p1009_p13)
}
 0x33c   :  { %676 = dma.vmem_to_hbm [thread:$0]  %s674_s18, 16, %s1268_s8, [#allocation13]  }
 0x33d   :  { %1019 = dma.done.wait [#allocation5], 256  }
 0x33e   :  { %1020 = vsyncadd [#allocation5], 4294967040 }
 0x33f   :  { %1021 = dma.done.wait [#allocation13], 32  }
 0x340   :  { %1022 = vsyncadd [#allocation13], 4294967264 }
 0x341   :  { %686 = vsyncpa [#allocation4], 1 }
 0x342   :  { %687 = vsyncpa [#allocation7], 1 }
 0x343   :  { %688 = vsyncpa [#allocation10], 1 }
 0x344   :  { %689 = vsyncpa [#allocation5], 1 }
 0x345   :  { %690 = vsyncpa [#allocation13], 1 }

</bundles_post_ra>
